<compile_context>
chip_gen: v5e
topology: v5e:2x2
jax: 0.10.0
libtpu: 0.0.40
codegen_flags: <defaults>
</compile_context>

<pallas_src>
import numpy as np
import jax
import jax.numpy as jnp
from jax.experimental import pallas as pl
from jax.experimental.pallas import tpu as pltpu


def _make_ddim_kernel(C, n_steps):
    """Fully-fused DDIM sampler body (all steps, eta == 0).

    coef_ref (VMEM, f32[C, n_steps*(C+1)]): per-step folded coefficients;
        column s*(C+1)+k  (k < C) = M_t[:, k]  with  M_t = a_t*I + b_t*W^T
        column s*(C+1)+C          = c_t        with  c_t = b_t * bias_t
    x_ref    (VMEM, f32[C, tm]): x_T tile (channels on sublanes, spatial lanes)
    o_ref    (VMEM, f32[C, tm]): final clipped x_0 tile
    """
    P = C + 1

    def kernel(coef_ref, x_ref, o_ref):
        x = x_ref[...]                       # (C, tm) — carried in vregs
        coef = coef_ref[...]                 # (C, n_steps*P), one tiny load

        # Static unroll over the DDIM steps (n_steps known at trace time).
        for s in range(n_steps):
            base = s * P
            acc = coef[:, base + C:base + P]                     # c_t, (C, 1)
            for k in range(C):                                   # 4 broadcast FMAs
                acc = acc + coef[:, base + k:base + k + 1] * x[k:k + 1, :]
            x = acc                                              # (C, tm)

        # final torch.clip(x_0, -1, 1) fused into the single store
        o_ref[...] = jnp.clip(x, -1.0, 1.0)

    return kernel


def make_ddim_sampler(B, C, HW, tm, n_steps):
    assert HW % tm == 0
    n_m = HW // tm
    P = C + 1

    # VMEM budget: in + out tiles double-buffered + padded coef table + slack.
    blk_bytes = C * tm * 4
    coef_bytes = 8 * max(128, n_steps * P) * 4
    need = 4 * blk_bytes + 2 * coef_bytes + (2 << 20)
    vmem_limit = int(min(max(need, 16 << 20), 48 << 20))   # safe on v5e/v6e/v7x

    return pl.pallas_call(
        _make_ddim_kernel(C, n_steps),
        out_shape=jax.ShapeDtypeStruct((B, C, HW), jnp.float32),
        grid=(B, n_m),                                          # both parallel
        in_specs=[
            pl.BlockSpec((C, n_steps * P), lambda b, m: (0, 0)),    # coef table
            pl.BlockSpec((None, C, tm), lambda b, m: (b, 0, m)),    # x_T tile
        ],
        out_specs=pl.BlockSpec((None, C, tm), lambda b, m: (b, 0, m)),
        compiler_params=pltpu.CompilerParams(
            dimension_semantics=("parallel", "parallel"),
            vmem_limit_bytes=vmem_limit),
    )


class DDIMSamplerPallas:
    """JAX/Pallas port of DDIMSampler (uniform schedule, eta=0, initial_state=None)."""

    def __init__(self, beta_1, beta_T, T, expected_timesteps=10, eta=0.0, C=4):
        assert eta == 0.0, "eta != 0 (stochastic DDIM) path not exercised here"
        self.T = T
        self.C = C

        # uniform method
        c = T // expected_timesteps
        self.ddim_timesteps = np.asarray(list(range(0, T, c)))
        self.ddim_prev_timesteps = np.concatenate([[0], self.ddim_timesteps[:-1]])

        # betas / alphas_bar (float64 like torch.double)
        betas = np.linspace(beta_1, beta_T, T, dtype=np.float64)
        alphas = 1.0 - betas
        self.alphas_bar = np.cumprod(alphas)

        # deterministic synthetic epsilon-model parameters
        W = 0.05 * np.eye(C) + 0.01 * ((np.arange(C * C).reshape(C, C) % 7) - 3)
        self.W_np = W.astype(np.float32)
        t_idx = np.arange(T)[:, None].astype(np.float64)
        c_idx = np.arange(C)[None, :].astype(np.float64)
        self.time_bias_np = (0.1 * np.sin((t_idx + 1.0) * (c_idx + 1.0) / T)).astype(np.float32)

        # flipped schedule
        self.flip_ts = np.flip(self.ddim_timesteps)
        self.flip_pts = np.flip(self.ddim_prev_timesteps)
        self.n_steps = len(self.flip_ts)

        # fold a_t / b_t / time_bias into per-step affine mixes (f64 math):
        #   x_{t_prev} = M_t @ x_t + c_t
        P = C + 1
        W64 = self.W_np.astype(np.float64)
        bias64 = self.time_bias_np.astype(np.float64)
        coef = np.zeros((C, self.n_steps * P), dtype=np.float64)
        for s, (ts, pts) in enumerate(zip(self.flip_ts, self.flip_pts)):
            alpha = self.alphas_bar[ts]
            alpha_prev = self.alphas_bar[pts]
            a_t = np.sqrt(alpha_prev) / np.sqrt(alpha)
            b_t = (np.sqrt(1.0 - alpha_prev)
                   - np.sqrt(alpha_prev) * np.sqrt(1.0 - alpha) / np.sqrt(alpha))
            M_t = a_t * np.eye(C) + b_t * W64.T          # M_t[c, k]
            coef[:, s * P: s * P + C] = M_t              # column k = M_t[:, k]
            coef[:, s * P + C] = b_t * bias64[ts]        # folded bias column
        self.coef_tbl = jnp.asarray(coef.astype(np.float32))   # (C, n_steps*(C+1))

    @staticmethod
    def _choose_tile(hw, max_tm=2048):
        # Largest multiple-of-128 divisor of H*W (<= max_tm); if H*W is not
        # lane-aligned, fall back to the full row (legal: block dim == array dim).
        if hw % 128 != 0:
            return hw
        best = 128
        for tm in range(128, min(hw, max_tm) + 1, 128):
            if hw % tm == 0:
                best = tm
        return best

    def sample(self, x_T):
        # TODO(synk): initial_state/strength branch (GaussianDiffuser.diffuse) and
        # eta != 0 stochastic noise path not implemented; matches the
        # initial_state=None, eta=0 path of the reference.
        B, C, H, W = x_T.shape
        assert C == self.C
        HW = H * W
        tm = self._choose_tile(HW)

        fused = make_ddim_sampler(B, C, HW, tm, self.n_steps)
        coef_tbl = self.coef_tbl

        @jax.jit
        def run(x):
            x3 = x.reshape(B, C, HW).astype(jnp.float32)     # free reshape, no transpose
            out = fused(coef_tbl, x3)                        # (B, C, HW)
            return out.reshape(B, C, H, W)                   # free reshape back

        return run(x_T)

    # pure-JAX reference (divide-then-multiply form, like the torch module)
    def sample_ref(self, x_T):
        B, C, H, W = x_T.shape
        x = jnp.transpose(x_T, (0, 2, 3, 1)).reshape(B * H * W, C).astype(jnp.float32)
        Wj = jnp.asarray(self.W_np)
        for ts, pts in zip(self.flip_ts, self.flip_pts):
            alpha = self.alphas_bar[ts]
            alpha_prev = self.alphas_bar[pts]
            e_t = x @ Wj + jnp.asarray(self.time_bias_np[int(ts)])[None, :]
            pred_x0 = (x - np.float32(np.sqrt(1.0 - alpha)) * e_t) / np.float32(np.sqrt(alpha))
            dir_xt = np.float32(np.sqrt(1.0 - alpha_prev)) * e_t
            x = np.float32(np.sqrt(alpha_prev)) * pred_x0 + dir_xt
        x = jnp.clip(x, -1.0, 1.0)
        return jnp.transpose(x.reshape(B, H, W, C), (0, 3, 1, 2))


if __name__ == "__main__":
    key = jax.random.PRNGKey(0)
    B, C, H, W = 2, 4, 16, 16
    x_T = jax.random.normal(key, (B, C, H, W), dtype=jnp.float32)

    sampler = DDIMSamplerPallas(beta_1=1e-4, beta_T=0.02, T=100,
                                expected_timesteps=10, eta=0.0, C=C)

    out = jax.block_until_ready(sampler.sample(x_T))
    ref = jax.block_until_ready(sampler.sample_ref(x_T))

    assert out.shape == (B, C, H, W)
    assert bool(jnp.all(jnp.isfinite(out)))
    assert bool(jnp.allclose(out, ref, atol=1e-4, rtol=1e-4))

    print("KERNEL_OK")
</pallas_src>

<mosaic_0001>
module attributes {stable_mosaic.version = 11 : i64} {
  func.func @kernel(%arg0: i32, %arg1: i32, %arg2: memref<4x50xf32, #tpu.memory_space<vmem>>, %arg3: memref<1x4x256xf32, #tpu.memory_space<vmem>>, %arg4: memref<1x4x256xf32, #tpu.memory_space<vmem>>) attributes {dimension_semantics = [#tpu.dimension_semantics<parallel>, #tpu.dimension_semantics<parallel>], iteration_bounds = array<i64: 2, 1>, scalar_prefetch = 0 : i64, scratch_operands = 0 : i64, tpu.core_type = #tpu.core_type<tc>, window_params = [{pipeline_mode = #tpu.pipeline_mode<synchronous>, transform_indices = @transform_0, window_bounds = array<i64: 4, 50>}, {transform_indices = @transform_1, window_bounds = array<i64: 1, 4, 256>}, {transform_indices = @transform_2, window_bounds = array<i64: 1, 4, 256>}]} {
    %c0 = arith.constant 0 : index
    %c0_0 = arith.constant 0 : index
    %c0_1 = arith.constant 0 : index
    %0 = vector.load %arg3[%c0, %c0_0, %c0_1] : memref<1x4x256xf32, #tpu.memory_space<vmem>>, vector<1x4x256xf32>
    %1 = vector.shape_cast %0 : vector<1x4x256xf32> to vector<4x256xf32>
    %c0_2 = arith.constant 0 : index
    %c0_3 = arith.constant 0 : index
    %2 = vector.load %arg2[%c0_2, %c0_3] : memref<4x50xf32, #tpu.memory_space<vmem>>, vector<4x50xf32>
    %3 = vector.extract_strided_slice %2 {offsets = [0, 4], sizes = [4, 1], strides = [1, 1]} : vector<4x50xf32> to vector<4x1xf32>
    %4 = vector.extract_strided_slice %2 {offsets = [0, 0], sizes = [4, 1], strides = [1, 1]} : vector<4x50xf32> to vector<4x1xf32>
    %5 = vector.extract_strided_slice %1 {offsets = [0, 0], sizes = [1, 256], strides = [1, 1]} : vector<4x256xf32> to vector<1x256xf32>
    %6 = vector.broadcast %4 : vector<4x1xf32> to vector<4x256xf32>
    %7 = vector.broadcast %5 : vector<1x256xf32> to vector<4x256xf32>
    %8 = arith.mulf %6, %7 : vector<4x256xf32>
    %9 = vector.broadcast %3 : vector<4x1xf32> to vector<4x256xf32>
    %10 = arith.addf %9, %8 : vector<4x256xf32>
    %11 = vector.extract_strided_slice %2 {offsets = [0, 1], sizes = [4, 1], strides = [1, 1]} : vector<4x50xf32> to vector<4x1xf32>
    %12 = vector.extract_strided_slice %1 {offsets = [1, 0], sizes = [1, 256], strides = [1, 1]} : vector<4x256xf32> to vector<1x256xf32>
    %13 = vector.broadcast %11 : vector<4x1xf32> to vector<4x256xf32>
    %14 = vector.broadcast %12 : vector<1x256xf32> to vector<4x256xf32>
    %15 = arith.mulf %13, %14 : vector<4x256xf32>
    %16 = arith.addf %10, %15 : vector<4x256xf32>
    %17 = vector.extract_strided_slice %2 {offsets = [0, 2], sizes = [4, 1], strides = [1, 1]} : vector<4x50xf32> to vector<4x1xf32>
    %18 = vector.extract_strided_slice %1 {offsets = [2, 0], sizes = [1, 256], strides = [1, 1]} : vector<4x256xf32> to vector<1x256xf32>
    %19 = vector.broadcast %17 : vector<4x1xf32> to vector<4x256xf32>
    %20 = vector.broadcast %18 : vector<1x256xf32> to vector<4x256xf32>
    %21 = arith.mulf %19, %20 : vector<4x256xf32>
    %22 = arith.addf %16, %21 : vector<4x256xf32>
    %23 = vector.extract_strided_slice %2 {offsets = [0, 3], sizes = [4, 1], strides = [1, 1]} : vector<4x50xf32> to vector<4x1xf32>
    %24 = vector.extract_strided_slice %1 {offsets = [3, 0], sizes = [1, 256], strides = [1, 1]} : vector<4x256xf32> to vector<1x256xf32>
    %25 = vector.broadcast %23 : vector<4x1xf32> to vector<4x256xf32>
    %26 = vector.broadcast %24 : vector<1x256xf32> to vector<4x256xf32>
    %27 = arith.mulf %25, %26 : vector<4x256xf32>
    %28 = arith.addf %22, %27 : vector<4x256xf32>
    %29 = vector.extract_strided_slice %2 {offsets = [0, 9], sizes = [4, 1], strides = [1, 1]} : vector<4x50xf32> to vector<4x1xf32>
    %30 = vector.extract_strided_slice %2 {offsets = [0, 5], sizes = [4, 1], strides = [1, 1]} : vector<4x50xf32> to vector<4x1xf32>
    %31 = vector.extract_strided_slice %28 {offsets = [0, 0], sizes = [1, 256], strides = [1, 1]} : vector<4x256xf32> to vector<1x256xf32>
    %32 = vector.broadcast %30 : vector<4x1xf32> to vector<4x256xf32>
    %33 = vector.broadcast %31 : vector<1x256xf32> to vector<4x256xf32>
    %34 = arith.mulf %32, %33 : vector<4x256xf32>
    %35 = vector.broadcast %29 : vector<4x1xf32> to vector<4x256xf32>
    %36 = arith.addf %35, %34 : vector<4x256xf32>
    %37 = vector.extract_strided_slice %2 {offsets = [0, 6], sizes = [4, 1], strides = [1, 1]} : vector<4x50xf32> to vector<4x1xf32>
    %38 = vector.extract_strided_slice %28 {offsets = [1, 0], sizes = [1, 256], strides = [1, 1]} : vector<4x256xf32> to vector<1x256xf32>
    %39 = vector.broadcast %37 : vector<4x1xf32> to vector<4x256xf32>
    %40 = vector.broadcast %38 : vector<1x256xf32> to vector<4x256xf32>
    %41 = arith.mulf %39, %40 : vector<4x256xf32>
    %42 = arith.addf %36, %41 : vector<4x256xf32>
    %43 = vector.extract_strided_slice %2 {offsets = [0, 7], sizes = [4, 1], strides = [1, 1]} : vector<4x50xf32> to vector<4x1xf32>
    %44 = vector.extract_strided_slice %28 {offsets = [2, 0], sizes = [1, 256], strides = [1, 1]} : vector<4x256xf32> to vector<1x256xf32>
    %45 = vector.broadcast %43 : vector<4x1xf32> to vector<4x256xf32>
    %46 = vector.broadcast %44 : vector<1x256xf32> to vector<4x256xf32>
    %47 = arith.mulf %45, %46 : vector<4x256xf32>
    %48 = arith.addf %42, %47 : vector<4x256xf32>
    %49 = vector.extract_strided_slice %2 {offsets = [0, 8], sizes = [4, 1], strides = [1, 1]} : vector<4x50xf32> to vector<4x1xf32>
    %50 = vector.extract_strided_slice %28 {offsets = [3, 0], sizes = [1, 256], strides = [1, 1]} : vector<4x256xf32> to vector<1x256xf32>
    %51 = vector.broadcast %49 : vector<4x1xf32> to vector<4x256xf32>
    %52 = vector.broadcast %50 : vector<1x256xf32> to vector<4x256xf32>
    %53 = arith.mulf %51, %52 : vector<4x256xf32>
    %54 = arith.addf %48, %53 : vector<4x256xf32>
    %55 = vector.extract_strided_slice %2 {offsets = [0, 14], sizes = [4, 1], strides = [1, 1]} : vector<4x50xf32> to vector<4x1xf32>
    %56 = vector.extract_strided_slice %2 {offsets = [0, 10], sizes = [4, 1], strides = [1, 1]} : vector<4x50xf32> to vector<4x1xf32>
    %57 = vector.extract_strided_slice %54 {offsets = [0, 0], sizes = [1, 256], strides = [1, 1]} : vector<4x256xf32> to vector<1x256xf32>
    %58 = vector.broadcast %56 : vector<4x1xf32> to vector<4x256xf32>
    %59 = vector.broadcast %57 : vector<1x256xf32> to vector<4x256xf32>
    %60 = arith.mulf %58, %59 : vector<4x256xf32>
    %61 = vector.broadcast %55 : vector<4x1xf32> to vector<4x256xf32>
    %62 = arith.addf %61, %60 : vector<4x256xf32>
    %63 = vector.extract_strided_slice %2 {offsets = [0, 11], sizes = [4, 1], strides = [1, 1]} : vector<4x50xf32> to vector<4x1xf32>
    %64 = vector.extract_strided_slice %54 {offsets = [1, 0], sizes = [1, 256], strides = [1, 1]} : vector<4x256xf32> to vector<1x256xf32>
    %65 = vector.broadcast %63 : vector<4x1xf32> to vector<4x256xf32>
    %66 = vector.broadcast %64 : vector<1x256xf32> to vector<4x256xf32>
    %67 = arith.mulf %65, %66 : vector<4x256xf32>
    %68 = arith.addf %62, %67 : vector<4x256xf32>
    %69 = vector.extract_strided_slice %2 {offsets = [0, 12], sizes = [4, 1], strides = [1, 1]} : vector<4x50xf32> to vector<4x1xf32>
    %70 = vector.extract_strided_slice %54 {offsets = [2, 0], sizes = [1, 256], strides = [1, 1]} : vector<4x256xf32> to vector<1x256xf32>
    %71 = vector.broadcast %69 : vector<4x1xf32> to vector<4x256xf32>
    %72 = vector.broadcast %70 : vector<1x256xf32> to vector<4x256xf32>
    %73 = arith.mulf %71, %72 : vector<4x256xf32>
    %74 = arith.addf %68, %73 : vector<4x256xf32>
    %75 = vector.extract_strided_slice %2 {offsets = [0, 13], sizes = [4, 1], strides = [1, 1]} : vector<4x50xf32> to vector<4x1xf32>
    %76 = vector.extract_strided_slice %54 {offsets = [3, 0], sizes = [1, 256], strides = [1, 1]} : vector<4x256xf32> to vector<1x256xf32>
    %77 = vector.broadcast %75 : vector<4x1xf32> to vector<4x256xf32>
    %78 = vector.broadcast %76 : vector<1x256xf32> to vector<4x256xf32>
    %79 = arith.mulf %77, %78 : vector<4x256xf32>
    %80 = arith.addf %74, %79 : vector<4x256xf32>
    %81 = vector.extract_strided_slice %2 {offsets = [0, 19], sizes = [4, 1], strides = [1, 1]} : vector<4x50xf32> to vector<4x1xf32>
    %82 = vector.extract_strided_slice %2 {offsets = [0, 15], sizes = [4, 1], strides = [1, 1]} : vector<4x50xf32> to vector<4x1xf32>
    %83 = vector.extract_strided_slice %80 {offsets = [0, 0], sizes = [1, 256], strides = [1, 1]} : vector<4x256xf32> to vector<1x256xf32>
    %84 = vector.broadcast %82 : vector<4x1xf32> to vector<4x256xf32>
    %85 = vector.broadcast %83 : vector<1x256xf32> to vector<4x256xf32>
    %86 = arith.mulf %84, %85 : vector<4x256xf32>
    %87 = vector.broadcast %81 : vector<4x1xf32> to vector<4x256xf32>
    %88 = arith.addf %87, %86 : vector<4x256xf32>
    %89 = vector.extract_strided_slice %2 {offsets = [0, 16], sizes = [4, 1], strides = [1, 1]} : vector<4x50xf32> to vector<4x1xf32>
    %90 = vector.extract_strided_slice %80 {offsets = [1, 0], sizes = [1, 256], strides = [1, 1]} : vector<4x256xf32> to vector<1x256xf32>
    %91 = vector.broadcast %89 : vector<4x1xf32> to vector<4x256xf32>
    %92 = vector.broadcast %90 : vector<1x256xf32> to vector<4x256xf32>
    %93 = arith.mulf %91, %92 : vector<4x256xf32>
    %94 = arith.addf %88, %93 : vector<4x256xf32>
    %95 = vector.extract_strided_slice %2 {offsets = [0, 17], sizes = [4, 1], strides = [1, 1]} : vector<4x50xf32> to vector<4x1xf32>
    %96 = vector.extract_strided_slice %80 {offsets = [2, 0], sizes = [1, 256], strides = [1, 1]} : vector<4x256xf32> to vector<1x256xf32>
    %97 = vector.broadcast %95 : vector<4x1xf32> to vector<4x256xf32>
    %98 = vector.broadcast %96 : vector<1x256xf32> to vector<4x256xf32>
    %99 = arith.mulf %97, %98 : vector<4x256xf32>
    %100 = arith.addf %94, %99 : vector<4x256xf32>
    %101 = vector.extract_strided_slice %2 {offsets = [0, 18], sizes = [4, 1], strides = [1, 1]} : vector<4x50xf32> to vector<4x1xf32>
    %102 = vector.extract_strided_slice %80 {offsets = [3, 0], sizes = [1, 256], strides = [1, 1]} : vector<4x256xf32> to vector<1x256xf32>
    %103 = vector.broadcast %101 : vector<4x1xf32> to vector<4x256xf32>
    %104 = vector.broadcast %102 : vector<1x256xf32> to vector<4x256xf32>
    %105 = arith.mulf %103, %104 : vector<4x256xf32>
    %106 = arith.addf %100, %105 : vector<4x256xf32>
    %107 = vector.extract_strided_slice %2 {offsets = [0, 24], sizes = [4, 1], strides = [1, 1]} : vector<4x50xf32> to vector<4x1xf32>
    %108 = vector.extract_strided_slice %2 {offsets = [0, 20], sizes = [4, 1], strides = [1, 1]} : vector<4x50xf32> to vector<4x1xf32>
    %109 = vector.extract_strided_slice %106 {offsets = [0, 0], sizes = [1, 256], strides = [1, 1]} : vector<4x256xf32> to vector<1x256xf32>
    %110 = vector.broadcast %108 : vector<4x1xf32> to vector<4x256xf32>
    %111 = vector.broadcast %109 : vector<1x256xf32> to vector<4x256xf32>
    %112 = arith.mulf %110, %111 : vector<4x256xf32>
    %113 = vector.broadcast %107 : vector<4x1xf32> to vector<4x256xf32>
    %114 = arith.addf %113, %112 : vector<4x256xf32>
    %115 = vector.extract_strided_slice %2 {offsets = [0, 21], sizes = [4, 1], strides = [1, 1]} : vector<4x50xf32> to vector<4x1xf32>
    %116 = vector.extract_strided_slice %106 {offsets = [1, 0], sizes = [1, 256], strides = [1, 1]} : vector<4x256xf32> to vector<1x256xf32>
    %117 = vector.broadcast %115 : vector<4x1xf32> to vector<4x256xf32>
    %118 = vector.broadcast %116 : vector<1x256xf32> to vector<4x256xf32>
    %119 = arith.mulf %117, %118 : vector<4x256xf32>
    %120 = arith.addf %114, %119 : vector<4x256xf32>
    %121 = vector.extract_strided_slice %2 {offsets = [0, 22], sizes = [4, 1], strides = [1, 1]} : vector<4x50xf32> to vector<4x1xf32>
    %122 = vector.extract_strided_slice %106 {offsets = [2, 0], sizes = [1, 256], strides = [1, 1]} : vector<4x256xf32> to vector<1x256xf32>
    %123 = vector.broadcast %121 : vector<4x1xf32> to vector<4x256xf32>
    %124 = vector.broadcast %122 : vector<1x256xf32> to vector<4x256xf32>
    %125 = arith.mulf %123, %124 : vector<4x256xf32>
    %126 = arith.addf %120, %125 : vector<4x256xf32>
    %127 = vector.extract_strided_slice %2 {offsets = [0, 23], sizes = [4, 1], strides = [1, 1]} : vector<4x50xf32> to vector<4x1xf32>
    %128 = vector.extract_strided_slice %106 {offsets = [3, 0], sizes = [1, 256], strides = [1, 1]} : vector<4x256xf32> to vector<1x256xf32>
    %129 = vector.broadcast %127 : vector<4x1xf32> to vector<4x256xf32>
    %130 = vector.broadcast %128 : vector<1x256xf32> to vector<4x256xf32>
    %131 = arith.mulf %129, %130 : vector<4x256xf32>
    %132 = arith.addf %126, %131 : vector<4x256xf32>
    %133 = vector.extract_strided_slice %2 {offsets = [0, 29], sizes = [4, 1], strides = [1, 1]} : vector<4x50xf32> to vector<4x1xf32>
    %134 = vector.extract_strided_slice %2 {offsets = [0, 25], sizes = [4, 1], strides = [1, 1]} : vector<4x50xf32> to vector<4x1xf32>
    %135 = vector.extract_strided_slice %132 {offsets = [0, 0], sizes = [1, 256], strides = [1, 1]} : vector<4x256xf32> to vector<1x256xf32>
    %136 = vector.broadcast %134 : vector<4x1xf32> to vector<4x256xf32>
    %137 = vector.broadcast %135 : vector<1x256xf32> to vector<4x256xf32>
    %138 = arith.mulf %136, %137 : vector<4x256xf32>
    %139 = vector.broadcast %133 : vector<4x1xf32> to vector<4x256xf32>
    %140 = arith.addf %139, %138 : vector<4x256xf32>
    %141 = vector.extract_strided_slice %2 {offsets = [0, 26], sizes = [4, 1], strides = [1, 1]} : vector<4x50xf32> to vector<4x1xf32>
    %142 = vector.extract_strided_slice %132 {offsets = [1, 0], sizes = [1, 256], strides = [1, 1]} : vector<4x256xf32> to vector<1x256xf32>
    %143 = vector.broadcast %141 : vector<4x1xf32> to vector<4x256xf32>
    %144 = vector.broadcast %142 : vector<1x256xf32> to vector<4x256xf32>
    %145 = arith.mulf %143, %144 : vector<4x256xf32>
    %146 = arith.addf %140, %145 : vector<4x256xf32>
    %147 = vector.extract_strided_slice %2 {offsets = [0, 27], sizes = [4, 1], strides = [1, 1]} : vector<4x50xf32> to vector<4x1xf32>
    %148 = vector.extract_strided_slice %132 {offsets = [2, 0], sizes = [1, 256], strides = [1, 1]} : vector<4x256xf32> to vector<1x256xf32>
    %149 = vector.broadcast %147 : vector<4x1xf32> to vector<4x256xf32>
    %150 = vector.broadcast %148 : vector<1x256xf32> to vector<4x256xf32>
    %151 = arith.mulf %149, %150 : vector<4x256xf32>
    %152 = arith.addf %146, %151 : vector<4x256xf32>
    %153 = vector.extract_strided_slice %2 {offsets = [0, 28], sizes = [4, 1], strides = [1, 1]} : vector<4x50xf32> to vector<4x1xf32>
    %154 = vector.extract_strided_slice %132 {offsets = [3, 0], sizes = [1, 256], strides = [1, 1]} : vector<4x256xf32> to vector<1x256xf32>
    %155 = vector.broadcast %153 : vector<4x1xf32> to vector<4x256xf32>
    %156 = vector.broadcast %154 : vector<1x256xf32> to vector<4x256xf32>
    %157 = arith.mulf %155, %156 : vector<4x256xf32>
    %158 = arith.addf %152, %157 : vector<4x256xf32>
    %159 = vector.extract_strided_slice %2 {offsets = [0, 34], sizes = [4, 1], strides = [1, 1]} : vector<4x50xf32> to vector<4x1xf32>
    %160 = vector.extract_strided_slice %2 {offsets = [0, 30], sizes = [4, 1], strides = [1, 1]} : vector<4x50xf32> to vector<4x1xf32>
    %161 = vector.extract_strided_slice %158 {offsets = [0, 0], sizes = [1, 256], strides = [1, 1]} : vector<4x256xf32> to vector<1x256xf32>
    %162 = vector.broadcast %160 : vector<4x1xf32> to vector<4x256xf32>
    %163 = vector.broadcast %161 : vector<1x256xf32> to vector<4x256xf32>
    %164 = arith.mulf %162, %163 : vector<4x256xf32>
    %165 = vector.broadcast %159 : vector<4x1xf32> to vector<4x256xf32>
    %166 = arith.addf %165, %164 : vector<4x256xf32>
    %167 = vector.extract_strided_slice %2 {offsets = [0, 31], sizes = [4, 1], strides = [1, 1]} : vector<4x50xf32> to vector<4x1xf32>
    %168 = vector.extract_strided_slice %158 {offsets = [1, 0], sizes = [1, 256], strides = [1, 1]} : vector<4x256xf32> to vector<1x256xf32>
    %169 = vector.broadcast %167 : vector<4x1xf32> to vector<4x256xf32>
    %170 = vector.broadcast %168 : vector<1x256xf32> to vector<4x256xf32>
    %171 = arith.mulf %169, %170 : vector<4x256xf32>
    %172 = arith.addf %166, %171 : vector<4x256xf32>
    %173 = vector.extract_strided_slice %2 {offsets = [0, 32], sizes = [4, 1], strides = [1, 1]} : vector<4x50xf32> to vector<4x1xf32>
    %174 = vector.extract_strided_slice %158 {offsets = [2, 0], sizes = [1, 256], strides = [1, 1]} : vector<4x256xf32> to vector<1x256xf32>
    %175 = vector.broadcast %173 : vector<4x1xf32> to vector<4x256xf32>
    %176 = vector.broadcast %174 : vector<1x256xf32> to vector<4x256xf32>
    %177 = arith.mulf %175, %176 : vector<4x256xf32>
    %178 = arith.addf %172, %177 : vector<4x256xf32>
    %179 = vector.extract_strided_slice %2 {offsets = [0, 33], sizes = [4, 1], strides = [1, 1]} : vector<4x50xf32> to vector<4x1xf32>
    %180 = vector.extract_strided_slice %158 {offsets = [3, 0], sizes = [1, 256], strides = [1, 1]} : vector<4x256xf32> to vector<1x256xf32>
    %181 = vector.broadcast %179 : vector<4x1xf32> to vector<4x256xf32>
    %182 = vector.broadcast %180 : vector<1x256xf32> to vector<4x256xf32>
    %183 = arith.mulf %181, %182 : vector<4x256xf32>
    %184 = arith.addf %178, %183 : vector<4x256xf32>
    %185 = vector.extract_strided_slice %2 {offsets = [0, 39], sizes = [4, 1], strides = [1, 1]} : vector<4x50xf32> to vector<4x1xf32>
    %186 = vector.extract_strided_slice %2 {offsets = [0, 35], sizes = [4, 1], strides = [1, 1]} : vector<4x50xf32> to vector<4x1xf32>
    %187 = vector.extract_strided_slice %184 {offsets = [0, 0], sizes = [1, 256], strides = [1, 1]} : vector<4x256xf32> to vector<1x256xf32>
    %188 = vector.broadcast %186 : vector<4x1xf32> to vector<4x256xf32>
    %189 = vector.broadcast %187 : vector<1x256xf32> to vector<4x256xf32>
    %190 = arith.mulf %188, %189 : vector<4x256xf32>
    %191 = vector.broadcast %185 : vector<4x1xf32> to vector<4x256xf32>
    %192 = arith.addf %191, %190 : vector<4x256xf32>
    %193 = vector.extract_strided_slice %2 {offsets = [0, 36], sizes = [4, 1], strides = [1, 1]} : vector<4x50xf32> to vector<4x1xf32>
    %194 = vector.extract_strided_slice %184 {offsets = [1, 0], sizes = [1, 256], strides = [1, 1]} : vector<4x256xf32> to vector<1x256xf32>
    %195 = vector.broadcast %193 : vector<4x1xf32> to vector<4x256xf32>
    %196 = vector.broadcast %194 : vector<1x256xf32> to vector<4x256xf32>
    %197 = arith.mulf %195, %196 : vector<4x256xf32>
    %198 = arith.addf %192, %197 : vector<4x256xf32>
    %199 = vector.extract_strided_slice %2 {offsets = [0, 37], sizes = [4, 1], strides = [1, 1]} : vector<4x50xf32> to vector<4x1xf32>
    %200 = vector.extract_strided_slice %184 {offsets = [2, 0], sizes = [1, 256], strides = [1, 1]} : vector<4x256xf32> to vector<1x256xf32>
    %201 = vector.broadcast %199 : vector<4x1xf32> to vector<4x256xf32>
    %202 = vector.broadcast %200 : vector<1x256xf32> to vector<4x256xf32>
    %203 = arith.mulf %201, %202 : vector<4x256xf32>
    %204 = arith.addf %198, %203 : vector<4x256xf32>
    %205 = vector.extract_strided_slice %2 {offsets = [0, 38], sizes = [4, 1], strides = [1, 1]} : vector<4x50xf32> to vector<4x1xf32>
    %206 = vector.extract_strided_slice %184 {offsets = [3, 0], sizes = [1, 256], strides = [1, 1]} : vector<4x256xf32> to vector<1x256xf32>
    %207 = vector.broadcast %205 : vector<4x1xf32> to vector<4x256xf32>
    %208 = vector.broadcast %206 : vector<1x256xf32> to vector<4x256xf32>
    %209 = arith.mulf %207, %208 : vector<4x256xf32>
    %210 = arith.addf %204, %209 : vector<4x256xf32>
    %211 = vector.extract_strided_slice %2 {offsets = [0, 44], sizes = [4, 1], strides = [1, 1]} : vector<4x50xf32> to vector<4x1xf32>
    %212 = vector.extract_strided_slice %2 {offsets = [0, 40], sizes = [4, 1], strides = [1, 1]} : vector<4x50xf32> to vector<4x1xf32>
    %213 = vector.extract_strided_slice %210 {offsets = [0, 0], sizes = [1, 256], strides = [1, 1]} : vector<4x256xf32> to vector<1x256xf32>
    %214 = vector.broadcast %212 : vector<4x1xf32> to vector<4x256xf32>
    %215 = vector.broadcast %213 : vector<1x256xf32> to vector<4x256xf32>
    %216 = arith.mulf %214, %215 : vector<4x256xf32>
    %217 = vector.broadcast %211 : vector<4x1xf32> to vector<4x256xf32>
    %218 = arith.addf %217, %216 : vector<4x256xf32>
    %219 = vector.extract_strided_slice %2 {offsets = [0, 41], sizes = [4, 1], strides = [1, 1]} : vector<4x50xf32> to vector<4x1xf32>
    %220 = vector.extract_strided_slice %210 {offsets = [1, 0], sizes = [1, 256], strides = [1, 1]} : vector<4x256xf32> to vector<1x256xf32>
    %221 = vector.broadcast %219 : vector<4x1xf32> to vector<4x256xf32>
    %222 = vector.broadcast %220 : vector<1x256xf32> to vector<4x256xf32>
    %223 = arith.mulf %221, %222 : vector<4x256xf32>
    %224 = arith.addf %218, %223 : vector<4x256xf32>
    %225 = vector.extract_strided_slice %2 {offsets = [0, 42], sizes = [4, 1], strides = [1, 1]} : vector<4x50xf32> to vector<4x1xf32>
    %226 = vector.extract_strided_slice %210 {offsets = [2, 0], sizes = [1, 256], strides = [1, 1]} : vector<4x256xf32> to vector<1x256xf32>
    %227 = vector.broadcast %225 : vector<4x1xf32> to vector<4x256xf32>
    %228 = vector.broadcast %226 : vector<1x256xf32> to vector<4x256xf32>
    %229 = arith.mulf %227, %228 : vector<4x256xf32>
    %230 = arith.addf %224, %229 : vector<4x256xf32>
    %231 = vector.extract_strided_slice %2 {offsets = [0, 43], sizes = [4, 1], strides = [1, 1]} : vector<4x50xf32> to vector<4x1xf32>
    %232 = vector.extract_strided_slice %210 {offsets = [3, 0], sizes = [1, 256], strides = [1, 1]} : vector<4x256xf32> to vector<1x256xf32>
    %233 = vector.broadcast %231 : vector<4x1xf32> to vector<4x256xf32>
    %234 = vector.broadcast %232 : vector<1x256xf32> to vector<4x256xf32>
    %235 = arith.mulf %233, %234 : vector<4x256xf32>
    %236 = arith.addf %230, %235 : vector<4x256xf32>
    %237 = vector.extract_strided_slice %2 {offsets = [0, 49], sizes = [4, 1], strides = [1, 1]} : vector<4x50xf32> to vector<4x1xf32>
    %238 = vector.extract_strided_slice %2 {offsets = [0, 45], sizes = [4, 1], strides = [1, 1]} : vector<4x50xf32> to vector<4x1xf32>
    %239 = vector.extract_strided_slice %236 {offsets = [0, 0], sizes = [1, 256], strides = [1, 1]} : vector<4x256xf32> to vector<1x256xf32>
    %240 = vector.broadcast %238 : vector<4x1xf32> to vector<4x256xf32>
    %241 = vector.broadcast %239 : vector<1x256xf32> to vector<4x256xf32>
    %242 = arith.mulf %240, %241 : vector<4x256xf32>
    %243 = vector.broadcast %237 : vector<4x1xf32> to vector<4x256xf32>
    %244 = arith.addf %243, %242 : vector<4x256xf32>
    %245 = vector.extract_strided_slice %2 {offsets = [0, 46], sizes = [4, 1], strides = [1, 1]} : vector<4x50xf32> to vector<4x1xf32>
    %246 = vector.extract_strided_slice %236 {offsets = [1, 0], sizes = [1, 256], strides = [1, 1]} : vector<4x256xf32> to vector<1x256xf32>
    %247 = vector.broadcast %245 : vector<4x1xf32> to vector<4x256xf32>
    %248 = vector.broadcast %246 : vector<1x256xf32> to vector<4x256xf32>
    %249 = arith.mulf %247, %248 : vector<4x256xf32>
    %250 = arith.addf %244, %249 : vector<4x256xf32>
    %251 = vector.extract_strided_slice %2 {offsets = [0, 47], sizes = [4, 1], strides = [1, 1]} : vector<4x50xf32> to vector<4x1xf32>
    %252 = vector.extract_strided_slice %236 {offsets = [2, 0], sizes = [1, 256], strides = [1, 1]} : vector<4x256xf32> to vector<1x256xf32>
    %253 = vector.broadcast %251 : vector<4x1xf32> to vector<4x256xf32>
    %254 = vector.broadcast %252 : vector<1x256xf32> to vector<4x256xf32>
    %255 = arith.mulf %253, %254 : vector<4x256xf32>
    %256 = arith.addf %250, %255 : vector<4x256xf32>
    %257 = vector.extract_strided_slice %2 {offsets = [0, 48], sizes = [4, 1], strides = [1, 1]} : vector<4x50xf32> to vector<4x1xf32>
    %258 = vector.extract_strided_slice %236 {offsets = [3, 0], sizes = [1, 256], strides = [1, 1]} : vector<4x256xf32> to vector<1x256xf32>
    %259 = vector.broadcast %257 : vector<4x1xf32> to vector<4x256xf32>
    %260 = vector.broadcast %258 : vector<1x256xf32> to vector<4x256xf32>
    %261 = arith.mulf %259, %260 : vector<4x256xf32>
    %262 = arith.addf %256, %261 : vector<4x256xf32>
    %cst = arith.constant -1.000000e+00 : f32
    %cst_4 = arith.constant 1.000000e+00 : f32
    %263 = vector.broadcast %cst : f32 to vector<4x256xf32>
    %264 = arith.maximumf %263, %262 : vector<4x256xf32>
    %265 = vector.broadcast %cst_4 : f32 to vector<4x256xf32>
    %266 = arith.minimumf %265, %264 : vector<4x256xf32>
    %c0_5 = arith.constant 0 : index
    %c0_6 = arith.constant 0 : index
    %c0_7 = arith.constant 0 : index
    %267 = vector.load %arg4[%c0_5, %c0_6, %c0_7] : memref<1x4x256xf32, #tpu.memory_space<vmem>>, vector<1x4x256xf32>
    %268 = vector.shape_cast %267 : vector<1x4x256xf32> to vector<4x256xf32>
    %269 = vector.shape_cast %266 : vector<4x256xf32> to vector<1x4x256xf32>
    tpu.vector_store %arg4[%c0_5, %c0_6, %c0_7], %269 {strides = array<i32>} : memref<1x4x256xf32, #tpu.memory_space<vmem>>, vector<1x4x256xf32>,
    return
  }
  func.func @transform_0(%arg0: i32, %arg1: i32) -> (i32, i32) {
    %c0_i32 = arith.constant 0 : i32
    %c0_i32_0 = arith.constant 0 : i32
    %c0_i32_1 = arith.constant 0 : i32
    return %c0_i32, %c0_i32_0 : i32, i32
  }
  func.func @transform_1(%arg0: i32, %arg1: i32) -> (i32, i32, i32) {
    %c0_i32 = arith.constant 0 : i32
    %c0_i32_0 = arith.constant 0 : i32
    return %arg0, %c0_i32, %arg1 : i32, i32, i32
  }
  func.func @transform_2(%arg0: i32, %arg1: i32) -> (i32, i32, i32) {
    %c0_i32 = arith.constant 0 : i32
    %c0_i32_0 = arith.constant 0 : i32
    return %arg0, %c0_i32, %arg1 : i32, i32, i32
  }
}

</mosaic_0001>

<bundles_post_ra>
// kernel: run.1
= control target key start
LH: loop header
LB: loop body
LE: loop exit
PB: predicated region body
PF: predicated region fallthrough
CT: control target
= control target key end

     0   :  { %s970_s9 = smov 0   ;;  %s972_s10 = smov 0   ;;  %s1071_s0 = inlined_call_operand.vmem [shape: f32[4,50], index: 0, kind: input, shape index: {}]   ;;  %s1072_s1 = inlined_call_operand.vmem [shape: f32[2,4,256], index: 1, kind: input, shape index: {}]   ;;  %s1073_s2 = inlined_call_operand.vmem [shape: f32[2,4,256], index: 2, kind: output, shape index: {}]  }
   0x1   :  { %s974_s11 = smov 0  }
   0x2 LB: > { %s24_s12 = sadd.s32 1, %s899_s10  ;;  %p745_p0 = scmp.ge.s32.totalorder %s903_s11, 1  ;;  %s903_s11 = sphi %s974_s11, %s12_s11   ;;  %s899_s10 = sphi %s972_s10, %s1075_s10   ;;  %s895_s9 = sphi %s970_s9, %s1074_s9  }
   0x3   : > { %p26_p1 = scmp.ge.s32.totalorder %s24_s12, 2  ;;  %p133_p2 = scmp.lt.s32.totalorder %s903_s11, 3 }
   0x5   : > { %s1077_s12 = smov (%p26_p1, %s24_s12), 0  ;;  %p134_p3 = pnand %p745_p0, %p133_p2 }
   0x6   : > { %p164_p4 = scmp.lt.s32.totalorder (!%p134_p3), %s895_s9, 1 }
   0x7   : > { %137 = sbr.rel (%p134_p3) target bundleno = 310 (0x136), region = 28 }
   0xc   : > { %v993_v0 = vld [vmem:[%s1071_s0] sm:$0xf]  ;;  %v905_v1 = vmov 1   ;;  %v906_v2 = vmov 0   ;;  %v907_v3 = vmov 3   ;;  %v908_v4 = vmov 2  }
   0xd   : > { %832 = vset.pattern.permute.xlu1 %v905_v1  ;;  %830 = vset.pattern.permute.xlu0 %v906_v2  ;;  %v909_v5 = vmov 4   ;;  %v910_v6 = vmov 5   ;;  %v911_v7 = vmov 9   ;;  %v912_v8 = vmov 7   ;;  %s1079_s9 = smov (!%p164_p4, %s895_s9), 1 }
   0xe   : > { %206 = vperm.xlu1 %832, %v993_v0   ;;  %187 = vperm.xlu0 %830, %v993_v0   ;;  %v913_v9 = vmov 6   ;;  %v914_v10 = vmov 8   ;;  %v915_v11 = vmov 12   ;;  %v916_v12 = vmov 10   ;;  %s754_s15 = sshll.u32 %s1079_s9, 3 }
   0xf   : > { %834 = vset.pattern.permute.xlu2 %v907_v3  ;;  %v917_v13 = vmov 14   ;;  %v918_v14 = vmov 17   ;;  %v919_v15 = vmov 11   ;;  %v920_v16 = vmov 13   ;;  %s171_s18 = scalar_lea.vmem %s1072_s1, %s754_s15  ;;  %s181_s21 = scalar_lea.vmem %s1073_s2, %s754_s15 }
  0x10   : > { %234 = vperm.xlu2 %834, %v993_v0   ;;  %v921_v17 = vmov 22   ;;  %v922_v18 = vmov 15   ;;  %v923_v19 = vmov 19   ;;  %v924_v20 = vmov 27   ;;  %v183_v37 = vld [vmem:[%s171_s18] sm:$0xff] }
  0x11   : > { %v925_v21 = vmov 16   ;;  %v926_v22 = vmov 18   ;;  %v927_v23 = vmov 20   ;;  %v928_v24 = vmov 32  }
  0x12   : > { %v929_v25 = vmov 24   ;;  %v930_v26 = vmov 21   ;;  %v931_v27 = vmov 23   ;;  %v932_v28 = vmov 25  }
  0x13   : > { %v933_v29 = vmov 37   ;;  %v934_v30 = vmov 29   ;;  %v935_v31 = vmov 26   ;;  %v936_v32 = vmov 28  }
  0x14   : > { %v937_v33 = vmov 30   ;;  %v938_v34 = vmov 34   ;;  %v939_v35 = vmov 31   ;;  %v940_v36 = vmov 42  }
  0x15   : > { %v191_v39 = vperm.slane %v183_v37, 0  ;;  %v192_v40 = vperm.slane %v183_v37, 4  ;;  %v209_v43 = vperm.slane %v183_v37, 1  ;;  %v210_v44 = vperm.slane %v183_v37, 5 }
  0x16   : > { %833 = vset.pattern.permute.xlu1 %v908_v4  ;;  %831 = vset.pattern.permute.xlu0 %v909_v5  ;;  %v941_v47 = vmov 33   ;;  %v223_v48 = vperm.slane %v183_v37, 2  ;;  %v224_v49 = vperm.slane %v183_v37, 6  ;;  %v942_v50 = vmov 35  }
  0x17   : > { %220 = vperm.xlu1 %833, %v993_v0   ;;  %200 = vperm.xlu0 %831, %v993_v0   ;;  %v195_v45 = vperm.slane %v191_v39, 0  ;;  %v196_v46 = vperm.slane %v192_v40, 0  ;;  %v237_v51 = vperm.slane %v183_v37, 3  ;;  %v238_v52 = vperm.slane %v183_v37, 7 }
  0x18   : > { %835 = vset.pattern.permute.xlu2 %v910_v6  ;;  %v213_v53 = vperm.slane %v209_v43, 1  ;;  %v214_v54 = vperm.slane %v210_v44, 1  ;;  %v227_v58 = vperm.slane %v223_v48, 2  ;;  %v228_v59 = vperm.slane %v224_v49, 2 }
  0x19   : > { %248 = vperm.xlu2 %835, %v993_v0   ;;  %v241_v60 = vperm.slane %v237_v51, 3  ;;  %v242_v61 = vperm.slane %v238_v52, 3  ;;  %v943_v5 = vmov 47   ;;  %v944_v6 = vmov 39  }
  0x1a   : > { %v948_v37 = vmov 48   ;;  %v949_v48 = vmov 44   ;;  %v950_v51 = vmov 41   ;;  %vm650_vm0 = vcmask 1043456  }
  0x1f   : > { %836 = vset.pattern.permute.xlu1 %v911_v7  ;;  %838 = vset.pattern.permute.xlu0 %v912_v8 }
  0x20   : > { %256 = vperm.xlu1 %836, %v993_v0   ;;  %272 = vperm.xlu0 %838, %v993_v0  }
  0x21   : > { %837 = vset.pattern.permute.xlu2 %v913_v9 }
  0x22   : > { %262 = vperm.xlu2 %837, %v993_v0  }
  0x28   : > { %839 = vset.pattern.permute.xlu1 %v914_v10  ;;  %843 = vset.pattern.permute.xlu0 %v915_v11  ;;  %v945_v11 = vmov 36  }
  0x29   : > { %282 = vperm.xlu1 %839, %v993_v0   ;;  %316 = vperm.xlu0 %843, %v993_v0  }
  0x2a   : > { %840 = vset.pattern.permute.xlu2 %v916_v12 }
  0x2b   : > { %292 = vperm.xlu2 %840, %v993_v0  }
  0x31   : > { %841 = vset.pattern.permute.xlu1 %v917_v13  ;;  %848 = vset.pattern.permute.xlu0 %v918_v14 }
  0x32   : > { %300 = vperm.xlu1 %841, %v993_v0   ;;  %360 = vperm.xlu0 %848, %v993_v0  }
  0x33   : > { %842 = vset.pattern.permute.xlu2 %v919_v15 }
  0x34   : > { %306 = vperm.xlu2 %842, %v993_v0  }
  0x3a   : > { %844 = vset.pattern.permute.xlu1 %v920_v16  ;;  %853 = vset.pattern.permute.xlu0 %v921_v17 }
  0x3b   : > { %326 = vperm.xlu1 %844, %v993_v0   ;;  %404 = vperm.xlu0 %853, %v993_v0  }
  0x3c   : > { %845 = vset.pattern.permute.xlu2 %v922_v18 }
  0x3d   : > { %336 = vperm.xlu2 %845, %v993_v0  }
  0x43   : > { %846 = vset.pattern.permute.xlu1 %v923_v19  ;;  %858 = vset.pattern.permute.xlu0 %v924_v20 }
  0x44   : > { %344 = vperm.xlu1 %846, %v993_v0   ;;  %448 = vperm.xlu0 %858, %v993_v0  }
  0x45   : > { %847 = vset.pattern.permute.xlu2 %v925_v21 }
  0x46   : > { %350 = vperm.xlu2 %847, %v993_v0  }
  0x4c   : > { %849 = vset.pattern.permute.xlu1 %v926_v22  ;;  %863 = vset.pattern.permute.xlu0 %v928_v24 }
  0x4d   : > { %370 = vperm.xlu1 %849, %v993_v0   ;;  %492 = vperm.xlu0 %863, %v993_v0  }
  0x4e   : > { %850 = vset.pattern.permute.xlu2 %v927_v23 }
  0x4f   : > { %380 = vperm.xlu2 %850, %v993_v0  }
  0x55   : > { %851 = vset.pattern.permute.xlu1 %v929_v25  ;;  %868 = vset.pattern.permute.xlu0 %v933_v29 }
  0x56   : > { %388 = vperm.xlu1 %851, %v993_v0   ;;  %536 = vperm.xlu0 %868, %v993_v0  }
  0x57   : > { %852 = vset.pattern.permute.xlu2 %v930_v26  ;;  %v946_v26 = vmov 38  }
  0x58   : > { %394 = vperm.xlu2 %852, %v993_v0  }
  0x5e   : > { %854 = vset.pattern.permute.xlu1 %v931_v27  ;;  %873 = vset.pattern.permute.xlu0 %v940_v36 }
  0x5f   : > { %414 = vperm.xlu1 %854, %v993_v0   ;;  %580 = vperm.xlu0 %873, %v993_v0  }
  0x60   : > { %855 = vset.pattern.permute.xlu2 %v932_v28 }
  0x61   : > { %424 = vperm.xlu2 %855, %v993_v0  }
  0x67   : > { %856 = vset.pattern.permute.xlu1 %v934_v30  ;;  %878 = vset.pattern.permute.xlu0 %v943_v5 }
  0x68   : > { %432 = vperm.xlu1 %856, %v993_v0   ;;  %624 = vperm.xlu0 %878, %v993_v0  }
  0x69   : > { %857 = vset.pattern.permute.xlu2 %v935_v31 }
  0x6a   : > { %438 = vperm.xlu2 %857, %v993_v0   ;;  %v235_v38 = vpop.permute.xlu2 %234 }
  0x6b   : > { %v243_v12 = vmul.f32 %v241_v60, %v235_v38  ;;  %v244_v13 = vmul.f32 %v242_v61, %v235_v38 }
  0x70   : > { %859 = vset.pattern.permute.xlu1 %v936_v32  ;;  %880 = vset.pattern.permute.xlu0 %v948_v37 }
  0x71   : > { %458 = vperm.xlu1 %859, %v993_v0  }
  0x72   : > { %860 = vset.pattern.permute.xlu2 %v937_v33  ;;  %v947_v33 = vmov 40  }
  0x73   : > { %468 = vperm.xlu2 %860, %v993_v0   ;;  %v249_v57 = vpop.permute.xlu2 %248 }
  0x79   : > { %861 = vset.pattern.permute.xlu1 %v938_v34 }
  0x7a   : > { %476 = vperm.xlu1 %861, %v993_v0  }
  0x7b   : > { %862 = vset.pattern.permute.xlu2 %v939_v35 }
  0x7c   : > { %482 = vperm.xlu2 %862, %v993_v0   ;;  %v263_v18 = vpop.permute.xlu2 %262 }
  0x80   : > { %v207_v41 = vpop.permute.xlu1 %206  ;;  %v188_v42 = vpop.permute.xlu0 %187 }
  0x81   : > { %v197_v55 = vmul.f32 %v195_v45, %v188_v42  ;;  %v198_v56 = vmul.f32 %v196_v46, %v188_v42  ;;  %v215_v1 = vmul.f32 %v213_v53, %v207_v41  ;;  %v216_v2 = vmul.f32 %v214_v54, %v207_v41 }
  0x82   : > { %864 = vset.pattern.permute.xlu1 %v941_v47 }
  0x83   : > { %502 = vperm.xlu1 %864, %v993_v0  }
  0x84   : > { %865 = vset.pattern.permute.xlu2 %v942_v50 }
  0x85   : > { %512 = vperm.xlu2 %865, %v993_v0   ;;  %v293_v42 = vpop.permute.xlu2 %292 }
  0x89   : > { %v221_v62 = vpop.permute.xlu1 %220  ;;  %v201_v63 = vpop.permute.xlu0 %200 }
  0x8a   : > { %v203_v3 = vadd.f32 %v201_v63, %v197_v55  ;;  %v204_v4 = vadd.f32 %v201_v63, %v198_v56  ;;  %v229_v7 = vmul.f32 %v227_v58, %v221_v62  ;;  %v230_v8 = vmul.f32 %v228_v59, %v221_v62 }
  0x8b   : > { %866 = vset.pattern.permute.xlu1 %v944_v6  ;;  %v951_v62 = vmov 43  }
  0x8c   : > { %v217_v9 = vadd.f32 %v215_v1, %v203_v3  ;;  %v218_v10 = vadd.f32 %v216_v2, %v204_v4  ;;  %520 = vperm.xlu1 %866, %v993_v0   ;;  %v952_v4 = vmov 45  }
  0x8d   : > { %867 = vset.pattern.permute.xlu2 %v945_v11 }
  0x8e   : > { %v231_v14 = vadd.f32 %v229_v7, %v217_v9  ;;  %v232_v15 = vadd.f32 %v230_v8, %v218_v10  ;;  %526 = vperm.xlu2 %867, %v993_v0   ;;  %v307_v59 = vpop.permute.xlu2 %306 }
  0x90   : > { %v245_v16 = vadd.f32 %v243_v12, %v231_v14  ;;  %v246_v17 = vadd.f32 %v244_v13, %v232_v15 }
  0x92   : > { %v265_v19 = vperm.slane %v245_v16, 1  ;;  %v266_v20 = vperm.slane %v246_v17, 1  ;;  %v257_v21 = vpop.permute.xlu1 %256  ;;  %v251_v22 = vperm.slane %v245_v16, 0  ;;  %v252_v23 = vperm.slane %v246_v17, 0  ;;  %v273_v34 = vpop.permute.xlu0 %272 }
  0x93   : > { %v275_v27 = vperm.slane %v245_v16, 2  ;;  %v276_v28 = vperm.slane %v246_v17, 2  ;;  %v285_v40 = vperm.slane %v245_v16, 3  ;;  %v286_v41 = vperm.slane %v246_v17, 3 }
  0x94   : > { %v253_v24 = vmul.f32 %v251_v22, %v249_v57  ;;  %v254_v25 = vmul.f32 %v252_v23, %v249_v57  ;;  %869 = vset.pattern.permute.xlu1 %v946_v26  ;;  %v267_v29 = vmul.f32 %v265_v19, %v263_v18  ;;  %v268_v30 = vmul.f32 %v266_v20, %v263_v18 }
  0x95   : > { %546 = vperm.xlu1 %869, %v993_v0   ;;  %v277_v38 = vmul.f32 %v275_v27, %v273_v34  ;;  %v278_v39 = vmul.f32 %v276_v28, %v273_v34  ;;  %v953_v18 = vmov 49  }
  0x96   : > { %v259_v31 = vadd.f32 %v257_v21, %v253_v24  ;;  %v260_v32 = vadd.f32 %v257_v21, %v254_v25  ;;  %870 = vset.pattern.permute.xlu2 %v947_v33  ;;  %v954_v21 = vmov 46  }
  0x97   : > { %556 = vperm.xlu2 %870, %v993_v0   ;;  %v337_v12 = vpop.permute.xlu2 %336 }
  0x98   : > { %v269_v35 = vadd.f32 %v267_v29, %v259_v31  ;;  %v270_v36 = vadd.f32 %v268_v30, %v260_v32 }
  0x9a   : > { %v279_v44 = vadd.f32 %v277_v38, %v269_v35  ;;  %v280_v45 = vadd.f32 %v278_v39, %v270_v36 }
  0x9b   : > { %v283_v43 = vpop.permute.xlu1 %282  ;;  %v317_v5 = vpop.permute.xlu0 %316 }
  0x9c   : > { %v287_v46 = vmul.f32 %v285_v40, %v283_v43  ;;  %v288_v47 = vmul.f32 %v286_v41, %v283_v43 }
  0x9d   : > { %871 = vset.pattern.permute.xlu1 %v949_v48 }
  0x9e   : > { %v289_v49 = vadd.f32 %v287_v46, %v279_v44  ;;  %v290_v50 = vadd.f32 %v288_v47, %v280_v45  ;;  %564 = vperm.xlu1 %871, %v993_v0  }
  0x9f   : > { %872 = vset.pattern.permute.xlu2 %v950_v51 }
  0xa0   : > { %570 = vperm.xlu2 %872, %v993_v0   ;;  %v295_v52 = vperm.slane %v289_v49, 0  ;;  %v296_v53 = vperm.slane %v290_v50, 0  ;;  %v309_v56 = vperm.slane %v289_v49, 1  ;;  %v310_v57 = vperm.slane %v290_v50, 1  ;;  %v351_v29 = vpop.permute.xlu2 %350 }
  0xa1   : > { %v319_v2 = vperm.slane %v289_v49, 2  ;;  %v320_v3 = vperm.slane %v290_v50, 2  ;;  %v329_v10 = vperm.slane %v289_v49, 3  ;;  %v330_v11 = vperm.slane %v290_v50, 3 }
  0xa2   : > { %v297_v54 = vmul.f32 %v295_v52, %v293_v42  ;;  %v298_v55 = vmul.f32 %v296_v53, %v293_v42  ;;  %v311_v63 = vmul.f32 %v309_v56, %v307_v59  ;;  %v312_v1 = vmul.f32 %v310_v57, %v307_v59 }
  0xa3   : > { %v321_v8 = vmul.f32 %v319_v2, %v317_v5  ;;  %v322_v9 = vmul.f32 %v320_v3, %v317_v5 }
  0xa4   : > { %v301_v58 = vpop.permute.xlu1 %300  ;;  %v361_v36 = vpop.permute.xlu0 %360 }
  0xa5   : > { %v303_v60 = vadd.f32 %v301_v58, %v297_v54  ;;  %v304_v61 = vadd.f32 %v301_v58, %v298_v55 }
  0xa6   : > { %874 = vset.pattern.permute.xlu1 %v951_v62 }
  0xa7   : > { %590 = vperm.xlu1 %874, %v993_v0   ;;  %v313_v6 = vadd.f32 %v311_v63, %v303_v60  ;;  %v314_v7 = vadd.f32 %v312_v1, %v304_v61 }
  0xa8   : > { %875 = vset.pattern.permute.xlu2 %v952_v4 }
  0xa9   : > { %600 = vperm.xlu2 %875, %v993_v0   ;;  %v323_v14 = vadd.f32 %v321_v8, %v313_v6  ;;  %v324_v15 = vadd.f32 %v322_v9, %v314_v7  ;;  %v381_v44 = vpop.permute.xlu2 %380 }
  0xad   : > { %v327_v13 = vpop.permute.xlu1 %326  ;;  %v405_v1 = vpop.permute.xlu0 %404 }
  0xae   : > { %v331_v16 = vmul.f32 %v329_v10, %v327_v13  ;;  %v332_v17 = vmul.f32 %v330_v11, %v327_v13 }
  0xaf   : > { %876 = vset.pattern.permute.xlu1 %v953_v18 }
  0xb0   : > { %v333_v19 = vadd.f32 %v331_v16, %v323_v14  ;;  %v334_v20 = vadd.f32 %v332_v17, %v324_v15  ;;  %608 = vperm.xlu1 %876, %v993_v0  }
  0xb1   : > { %877 = vset.pattern.permute.xlu2 %v954_v21 }
  0xb2   : > { %614 = vperm.xlu2 %877, %v993_v0   ;;  %v339_v22 = vperm.slane %v333_v19, 0  ;;  %v340_v23 = vperm.slane %v334_v20, 0  ;;  %v353_v26 = vperm.slane %v333_v19, 1  ;;  %v354_v27 = vperm.slane %v334_v20, 1  ;;  %v395_v57 = vpop.permute.xlu2 %394 }
  0xb3   : > { %v363_v34 = vperm.slane %v333_v19, 2  ;;  %v364_v35 = vperm.slane %v334_v20, 2  ;;  %v373_v42 = vperm.slane %v333_v19, 3  ;;  %v374_v43 = vperm.slane %v334_v20, 3 }
  0xb4   : > { %v341_v24 = vmul.f32 %v339_v22, %v337_v12  ;;  %v342_v25 = vmul.f32 %v340_v23, %v337_v12  ;;  %v355_v32 = vmul.f32 %v353_v26, %v351_v29  ;;  %v356_v33 = vmul.f32 %v354_v27, %v351_v29 }
  0xb5   : > { %v365_v40 = vmul.f32 %v363_v34, %v361_v36  ;;  %v366_v41 = vmul.f32 %v364_v35, %v361_v36 }
  0xb6   : > { %v345_v28 = vpop.permute.xlu1 %344 }
  0xb7   : > { %v347_v30 = vadd.f32 %v345_v28, %v341_v24  ;;  %v348_v31 = vadd.f32 %v345_v28, %v342_v25 }
  0xb8   : > { %879 = vset.pattern.permute.xlu1 %v948_v37 }
  0xb9   : > { %634 = vperm.xlu1 %879, %v993_v0   ;;  %v357_v38 = vadd.f32 %v355_v32, %v347_v30  ;;  %v358_v39 = vadd.f32 %v356_v33, %v348_v31  ;;  %v449_v30 = vpop.permute.xlu0 %448 }
  0xbb   : > { %v367_v46 = vadd.f32 %v365_v40, %v357_v38  ;;  %v368_v47 = vadd.f32 %v366_v41, %v358_v39  ;;  %v425_v8 = vpop.permute.xlu2 %424 }
  0xbf   : > { %v371_v45 = vpop.permute.xlu1 %370 }
  0xc0   : > { %v375_v48 = vmul.f32 %v373_v42, %v371_v45  ;;  %v376_v49 = vmul.f32 %v374_v43, %v371_v45 }
  0xc2   : > { %v377_v37 = vadd.f32 %v375_v48, %v367_v46  ;;  %v378_v50 = vadd.f32 %v376_v49, %v368_v47 }
  0xc4   : > { %v383_v0 = vperm.slane %v377_v37, 0  ;;  %v384_v51 = vperm.slane %v378_v50, 0  ;;  %v397_v54 = vperm.slane %v377_v37, 1  ;;  %v398_v55 = vperm.slane %v378_v50, 1  ;;  %v439_v23 = vpop.permute.xlu2 %438 }
  0xc5   : > { %v407_v62 = vperm.slane %v377_v37, 2  ;;  %v408_v63 = vperm.slane %v378_v50, 2  ;;  %v417_v6 = vperm.slane %v377_v37, 3  ;;  %v418_v7 = vperm.slane %v378_v50, 3 }
  0xc6   : > { %v385_v52 = vmul.f32 %v383_v0, %v381_v44  ;;  %v386_v53 = vmul.f32 %v384_v51, %v381_v44  ;;  %v399_v60 = vmul.f32 %v397_v54, %v395_v57  ;;  %v400_v61 = vmul.f32 %v398_v55, %v395_v57 }
  0xc7   : > { %v409_v4 = vmul.f32 %v407_v62, %v405_v1  ;;  %v410_v5 = vmul.f32 %v408_v63, %v405_v1 }
  0xc8   : > { %v389_v56 = vpop.permute.xlu1 %388 }
  0xc9   : > { %v391_v58 = vadd.f32 %v389_v56, %v385_v52  ;;  %v392_v59 = vadd.f32 %v389_v56, %v386_v53 }
  0xcb   : > { %v401_v2 = vadd.f32 %v399_v60, %v391_v58  ;;  %v402_v3 = vadd.f32 %v400_v61, %v392_v59  ;;  %v493_v58 = vpop.permute.xlu0 %492 }
  0xcd   : > { %v411_v10 = vadd.f32 %v409_v4, %v401_v2  ;;  %v412_v11 = vadd.f32 %v410_v5, %v402_v3  ;;  %v469_v38 = vpop.permute.xlu2 %468 }
  0xd1   : > { %v415_v9 = vpop.permute.xlu1 %414 }
  0xd2   : > { %v419_v12 = vmul.f32 %v417_v6, %v415_v9  ;;  %v420_v13 = vmul.f32 %v418_v7, %v415_v9 }
  0xd4   : > { %v421_v14 = vadd.f32 %v419_v12, %v411_v10  ;;  %v422_v15 = vadd.f32 %v420_v13, %v412_v11 }
  0xd6   : > { %v427_v16 = vperm.slane %v421_v14, 0  ;;  %v428_v17 = vperm.slane %v422_v15, 0  ;;  %v441_v20 = vperm.slane %v421_v14, 1  ;;  %v442_v21 = vperm.slane %v422_v15, 1  ;;  %v483_v51 = vpop.permute.xlu2 %482 }
  0xd7   : > { %v451_v28 = vperm.slane %v421_v14, 2  ;;  %v452_v29 = vperm.slane %v422_v15, 2  ;;  %v461_v35 = vperm.slane %v421_v14, 3  ;;  %v462_v36 = vperm.slane %v422_v15, 3 }
  0xd8   : > { %v429_v18 = vmul.f32 %v427_v16, %v425_v8  ;;  %v430_v19 = vmul.f32 %v428_v17, %v425_v8  ;;  %v443_v26 = vmul.f32 %v441_v20, %v439_v23  ;;  %v444_v27 = vmul.f32 %v442_v21, %v439_v23 }
  0xd9   : > { %v453_v33 = vmul.f32 %v451_v28, %v449_v30  ;;  %v454_v34 = vmul.f32 %v452_v29, %v449_v30 }
  0xda   : > { %v433_v22 = vpop.permute.xlu1 %432 }
  0xdb   : > { %v435_v24 = vadd.f32 %v433_v22, %v429_v18  ;;  %v436_v25 = vadd.f32 %v433_v22, %v430_v19 }
  0xdd   : > { %v445_v31 = vadd.f32 %v443_v26, %v435_v24  ;;  %v446_v32 = vadd.f32 %v444_v27, %v436_v25  ;;  %v537_v24 = vpop.permute.xlu0 %536 }
  0xdf   : > { %v455_v40 = vadd.f32 %v453_v33, %v445_v31  ;;  %v456_v41 = vadd.f32 %v454_v34, %v446_v32  ;;  %v513_v2 = vpop.permute.xlu2 %512 }
  0xe3   : > { %v459_v39 = vpop.permute.xlu1 %458 }
  0xe4   : > { %v463_v42 = vmul.f32 %v461_v35, %v459_v39  ;;  %v464_v43 = vmul.f32 %v462_v36, %v459_v39 }
  0xe6   : > { %v465_v44 = vadd.f32 %v463_v42, %v455_v40  ;;  %v466_v45 = vadd.f32 %v464_v43, %v456_v41 }
  0xe8   : > { %v471_v46 = vperm.slane %v465_v44, 0  ;;  %v472_v47 = vperm.slane %v466_v45, 0  ;;  %v485_v37 = vperm.slane %v465_v44, 1  ;;  %v486_v50 = vperm.slane %v466_v45, 1  ;;  %v527_v17 = vpop.permute.xlu2 %526 }
  0xe9   : > { %v495_v56 = vperm.slane %v465_v44, 2  ;;  %v496_v57 = vperm.slane %v466_v45, 2  ;;  %v505_v63 = vperm.slane %v465_v44, 3  ;;  %v506_v1 = vperm.slane %v466_v45, 3 }
  0xea   : > { %v473_v48 = vmul.f32 %v471_v46, %v469_v38  ;;  %v474_v49 = vmul.f32 %v472_v47, %v469_v38  ;;  %v487_v54 = vmul.f32 %v485_v37, %v483_v51  ;;  %v488_v55 = vmul.f32 %v486_v50, %v483_v51 }
  0xeb   : > { %v497_v61 = vmul.f32 %v495_v56, %v493_v58  ;;  %v498_v62 = vmul.f32 %v496_v57, %v493_v58 }
  0xec   : > { %v477_v0 = vpop.permute.xlu1 %476 }
  0xed   : > { %v479_v52 = vadd.f32 %v477_v0, %v473_v48  ;;  %v480_v53 = vadd.f32 %v477_v0, %v474_v49 }
  0xef   : > { %v489_v59 = vadd.f32 %v487_v54, %v479_v52  ;;  %v490_v60 = vadd.f32 %v488_v55, %v480_v53  ;;  %v581_v52 = vpop.permute.xlu0 %580 }
  0xf1   : > { %v499_v4 = vadd.f32 %v497_v61, %v489_v59  ;;  %v500_v5 = vadd.f32 %v498_v62, %v490_v60  ;;  %v557_v31 = vpop.permute.xlu2 %556 }
  0xf5   : > { %v503_v3 = vpop.permute.xlu1 %502 }
  0xf6   : > { %v507_v6 = vmul.f32 %v505_v63, %v503_v3  ;;  %v508_v7 = vmul.f32 %v506_v1, %v503_v3 }
  0xf8   : > { %v509_v8 = vadd.f32 %v507_v6, %v499_v4  ;;  %v510_v9 = vadd.f32 %v508_v7, %v500_v5 }
  0xfa   : > { %v515_v10 = vperm.slane %v509_v8, 0  ;;  %v516_v11 = vperm.slane %v510_v9, 0  ;;  %v529_v14 = vperm.slane %v509_v8, 1  ;;  %v530_v15 = vperm.slane %v510_v9, 1  ;;  %v571_v47 = vpop.permute.xlu2 %570 }
  0xfb   : > { %v539_v22 = vperm.slane %v509_v8, 2  ;;  %v540_v23 = vperm.slane %v510_v9, 2  ;;  %v549_v29 = vperm.slane %v509_v8, 3  ;;  %v550_v30 = vperm.slane %v510_v9, 3 }
  0xfc   : > { %v517_v12 = vmul.f32 %v515_v10, %v513_v2  ;;  %v518_v13 = vmul.f32 %v516_v11, %v513_v2  ;;  %v531_v20 = vmul.f32 %v529_v14, %v527_v17  ;;  %v532_v21 = vmul.f32 %v530_v15, %v527_v17 }
  0xfd   : > { %v541_v27 = vmul.f32 %v539_v22, %v537_v24  ;;  %v542_v28 = vmul.f32 %v540_v23, %v537_v24 }
  0xfe   : > { %v521_v16 = vpop.permute.xlu1 %520 }
  0xff   : > { %v523_v18 = vadd.f32 %v521_v16, %v517_v12  ;;  %v524_v19 = vadd.f32 %v521_v16, %v518_v13 }
 0x101   : > { %v533_v25 = vadd.f32 %v531_v20, %v523_v18  ;;  %v534_v26 = vadd.f32 %v532_v21, %v524_v19  ;;  %v625_v18 = vpop.permute.xlu0 %624 }
 0x103   : > { %v543_v33 = vadd.f32 %v541_v27, %v533_v25  ;;  %v544_v34 = vadd.f32 %v542_v28, %v534_v26  ;;  %v601_v59 = vpop.permute.xlu2 %600 }
 0x107   : > { %v547_v32 = vpop.permute.xlu1 %546 }
 0x108   : > { %v551_v35 = vmul.f32 %v549_v29, %v547_v32  ;;  %v552_v36 = vmul.f32 %v550_v30, %v547_v32 }
 0x10a   : > { %v553_v38 = vadd.f32 %v551_v35, %v543_v33  ;;  %v554_v39 = vadd.f32 %v552_v36, %v544_v34 }
 0x10c   : > { %v559_v40 = vperm.slane %v553_v38, 0  ;;  %v560_v41 = vperm.slane %v554_v39, 0  ;;  %v573_v44 = vperm.slane %v553_v38, 1  ;;  %v574_v45 = vperm.slane %v554_v39, 1  ;;  %v615_v11 = vpop.permute.xlu2 %614 }
 0x10d   : > { %v583_v0 = vperm.slane %v553_v38, 2  ;;  %v584_v51 = vperm.slane %v554_v39, 2  ;;  %v593_v57 = vperm.slane %v553_v38, 3  ;;  %v594_v58 = vperm.slane %v554_v39, 3 }
 0x10e   : > { %v561_v42 = vmul.f32 %v559_v40, %v557_v31  ;;  %v562_v43 = vmul.f32 %v560_v41, %v557_v31  ;;  %v575_v37 = vmul.f32 %v573_v44, %v571_v47  ;;  %v576_v50 = vmul.f32 %v574_v45, %v571_v47 }
 0x10f   : > { %v585_v55 = vmul.f32 %v583_v0, %v581_v52  ;;  %v586_v56 = vmul.f32 %v584_v51, %v581_v52 }
 0x110   : > { %v565_v46 = vpop.permute.xlu1 %564 }
 0x111   : > { %v567_v48 = vadd.f32 %v565_v46, %v561_v42  ;;  %v568_v49 = vadd.f32 %v565_v46, %v562_v43 }
 0x113   : > { %v577_v53 = vadd.f32 %v575_v37, %v567_v48  ;;  %v578_v54 = vadd.f32 %v576_v50, %v568_v49 }
 0x115   : > { %v587_v61 = vadd.f32 %v585_v55, %v577_v53  ;;  %v588_v62 = vadd.f32 %v586_v56, %v578_v54 }
 0x119   : > { %v591_v60 = vpop.permute.xlu1 %590 }
 0x11a   : > { %v595_v63 = vmul.f32 %v593_v57, %v591_v60  ;;  %v596_v1 = vmul.f32 %v594_v58, %v591_v60 }
 0x11c   : > { %v597_v2 = vadd.f32 %v595_v63, %v587_v61  ;;  %v598_v3 = vadd.f32 %v596_v1, %v588_v62 }
 0x11e   : > { %v603_v4 = vperm.slane %v597_v2, 0  ;;  %v604_v5 = vperm.slane %v598_v3, 0  ;;  %v617_v8 = vperm.slane %v597_v2, 1  ;;  %v618_v9 = vperm.slane %v598_v3, 1 }
 0x11f   : > { %v627_v16 = vperm.slane %v597_v2, 2  ;;  %v628_v17 = vperm.slane %v598_v3, 2  ;;  %v637_v23 = vperm.slane %v597_v2, 3  ;;  %v638_v24 = vperm.slane %v598_v3, 3 }
 0x120   : > { %v605_v6 = vmul.f32 %v603_v4, %v601_v59  ;;  %v606_v7 = vmul.f32 %v604_v5, %v601_v59  ;;  %v619_v14 = vmul.f32 %v617_v8, %v615_v11  ;;  %v620_v15 = vmul.f32 %v618_v9, %v615_v11 }
 0x121   : > { %v629_v21 = vmul.f32 %v627_v16, %v625_v18  ;;  %v630_v22 = vmul.f32 %v628_v17, %v625_v18 }
 0x122   : > { %v609_v10 = vpop.permute.xlu1 %608 }
 0x123   : > { %v611_v12 = vadd.f32 %v609_v10, %v605_v6  ;;  %v612_v13 = vadd.f32 %v609_v10, %v606_v7 }
 0x125   : > { %v621_v19 = vadd.f32 %v619_v14, %v611_v12  ;;  %v622_v20 = vadd.f32 %v620_v15, %v612_v13 }
 0x127   : > { %v631_v26 = vadd.f32 %v629_v21, %v621_v19  ;;  %v632_v27 = vadd.f32 %v630_v22, %v622_v20 }
 0x12b   : > { %v635_v25 = vpop.permute.xlu1 %634 }
 0x12c   : > { %v639_v28 = vmul.f32 %v637_v23, %v635_v25  ;;  %v640_v29 = vmul.f32 %v638_v24, %v635_v25 }
 0x12e   : > { %v641_v30 = vadd.f32 %v639_v28, %v631_v26  ;;  %v642_v31 = vadd.f32 %v640_v29, %v632_v27 }
 0x130   : > { %v751_v32 = vclamps-f32 %v642_v31, 1.0  ;;  %v750_v33 = vclamps-f32 %v641_v30, 1.0 }
 0x132   : > { %v649_v34 = vrot.slane %v751_v32, 4 }
 0x134   : > { %v651_v35 = vsel %vm650_vm0, %v750_v33, %v649_v34 }
 0x135   : > { %653 = vst [vmem:[%s181_s21] sm:$0xff] %v651_v35 }
 0x136 PF: > { %s12_s11 = sadd.s32 1, %s903_s11   ;;  %s1074_s9 = smov %s899_s10 }
 0x137   : > { %p9_p5 = scmp.ge.s32.totalorder %s12_s11, 4   ;;  %s1075_s10 = smov %s1077_s12 }
 0x139   :  { %11 = sbr.rel (!%p9_p5) target bundleno = 2 (0x2), region = 58 }

</bundles_post_ra>
